<compile_context>
chip_gen: v7x
topology: tpu7x:2x2x1
jax: 0.10.0
libtpu: 0.0.40
codegen_flags: <defaults>
</compile_context>

<pallas_src>
import functools
import math

import jax
import jax.numpy as jnp
from jax.experimental import pallas as pl
from jax.experimental.pallas import tpu as pltpu


# ------------------------------ small helpers -------------------------------

def _round_up(x: int, m: int) -> int:
    return ((x + m - 1) // m) * m


def _row_tile(dim: int, target: int):
    """(tile, padded_dim) for an entity axis (nodes / nets / edges).

    The tile is a multiple of 128 unless it spans the whole (8-aligned) padded
    axis, so it is legal both as a sublane (second-to-last) and a lane (last)
    block dimension of the dense graph operators.
    """
    if dim > target:
        return target, _round_up(dim, target)
    padded = _round_up(dim, 8)
    return padded, padded


def _pad2(x, rows: int, cols: int):
    return jnp.pad(x, ((0, rows - x.shape[0]), (0, cols - x.shape[1])))


def _vmem_limit_bytes(block_shapes, scratch_elems: int) -> int:
    """Explicit scoped-VMEM budget: blocks are double-buffered by the pipeline;
    keep the cap under v7x's 64 MiB physical VMEM."""
    blk = sum(math.prod(s) for s in block_shapes)
    est = 4 * (2 * blk + scratch_elems)          # f32 upper bound
    return int(min(max(4 * est, 32 * 2 ** 20), 56 * 2 ** 20))


# ----------------------------- Pallas kernels --------------------------------

def graphconv_kernel(a_ref, x_ref, w_ref, b_ref, o_ref, acc_ref, *, xw_first):
    """GraphConv('pins', node->net, norm='both'):
         out_net = A_norm @ node_feat @ W + b
       Grid: (net-row tiles ['parallel'], node contraction tiles ['arbitrary']).
    """
    k = pl.program_id(1)

    @pl.when(k == 0)
    def _init():
        acc_ref[...] = jnp.zeros_like(acc_ref)

    if xw_first:
        # out_feats <= in_feats: shrink the K dim of the big A-matmul.
        xw = jnp.dot(x_ref[...], w_ref[...], preferred_element_type=jnp.float32)
        acc_ref[...] += jnp.dot(a_ref[...], xw.astype(a_ref.dtype),
                                preferred_element_type=jnp.float32)
    else:
        acc_ref[...] += jnp.dot(a_ref[...], x_ref[...],
                                preferred_element_type=jnp.float32)

    @pl.when(k == pl.num_programs(1) - 1)
    def _finalize():
        if xw_first:
            res = acc_ref[...]
        else:
            res = jnp.dot(acc_ref[...], w_ref[...],
                          preferred_element_type=jnp.float32)
        o_ref[...] = (res + b_ref[...]).astype(o_ref.dtype)


def nnconv_kernel(pin_ref, w2_ref, s_ref, netrep_ref, netb2_ref, r_ref, m_ref,
                  bnn_ref, o_ref, acc_ref):
    """NNConv('pinned', net->node, aggregator='mean', edge_func=lin2):
         W_e[e,(i,o)] = (pin_feat @ W2 + b2)[e,(i,o)]
         msg[e,o]     = sum_i net_feat[src(e), i] * W_e[e,(i,o)]
         out_node     = mean-scatter(msg) + b_nn
       W2 columns are pre-permuted to (o, i)-major so the hs expansion is just
       the gather matmul on a lane-tiled net operand (no Q kron matmul), and
       the lin2 bias is folded out of the wide elementwise path into the small
       s @ (net @ b2) matmul.
       Grid: (node-row tiles ['parallel'], edge contraction tiles ['arbitrary']).
    """
    k = pl.program_id(1)

    @pl.when(k == 0)
    def _init():
        acc_ref[...] = jnp.zeros_like(acc_ref)

    # Edge weights from lin2 (bias folded out of this wide intermediate).
    we = jnp.dot(pin_ref[...], w2_ref[...], preferred_element_type=jnp.float32)
    # Gather + expand source-net features in one matmul: hs_rep[e, o*Hnet + i].
    hs_rep = jnp.dot(s_ref[...], netrep_ref[...],
                     preferred_element_type=jnp.float32)
    # msg[e,o] = sum_i hs[e,i] * (pin@W2)[e,(i,o)]   (elementwise kept in f32)
    msg = jnp.dot(hs_rep * we, r_ref[...], preferred_element_type=jnp.float32)
    # + folded b2 term: sum_i hs[e,i] * b2[(i,o)] == (s @ (net @ b2m))[e,o]
    msg = msg + jnp.dot(s_ref[...], netb2_ref[...],
                        preferred_element_type=jnp.float32)
    # Mean-scatter onto destination nodes, accumulated over edge tiles.
    acc_ref[...] += jnp.dot(m_ref[...], msg.astype(m_ref.dtype),
                            preferred_element_type=jnp.float32)

    @pl.when(k == pl.num_programs(1) - 1)
    def _finalize():
        o_ref[...] = (acc_ref[...] + bnn_ref[...]).astype(o_ref.dtype)


# ------------------------ graph operators (built once) -----------------------

def build_graph_operators(n_node, n_net, pins_src, pins_dst,
                          pinned_src, pinned_dst):
    """Dense, degree-normalized graph operators.

    Pure functions of the connectivity (not of features/params): for a static
    graph they are built ONCE and reused across forward passes.
    """
    f32 = jnp.float32
    # GraphConv(norm='both') normalized adjacency  A_norm: [N_net, N_node]
    adj = jnp.zeros((n_net, n_node), f32).at[pins_dst, pins_src].add(1.0)
    deg_src = jnp.maximum(adj.sum(axis=0), 1.0)   # node out-degree over 'pins'
    deg_dst = jnp.maximum(adj.sum(axis=1), 1.0)   # net  in-degree  over 'pins'
    a_norm = (deg_dst ** -0.5)[:, None] * adj * (deg_src ** -0.5)[None, :]

    # NNConv gather (edge <- src net) and mean-scatter (dst node <- edge).
    s_gather = jax.nn.one_hot(pinned_src, n_net, dtype=f32)           # [E, N_net]
    deg_in = jnp.maximum(jnp.zeros((n_node,), f32).at[pinned_dst].add(1.0), 1.0)
    m_mean = jax.nn.one_hot(pinned_dst, n_node, dtype=f32).T / deg_in[:, None]
    return a_norm, s_gather, m_mean


# ------------------------------- forward pass --------------------------------

def node_net_gnn_forward(node_feat, net_feat, pin_feat, a_norm, s_gather, m_mean,
                         params, *, compute_dtype=jnp.float32,
                         row_tile_target=256, edge_tile_target=256):
    """Pallas implementation of NodeNetGNN.forward (use_edge_attr=True).

    compute_dtype=jnp.bfloat16 halves VMEM/HBM traffic of the MXU operands on
    v6e/v7x (f32 accumulation is kept); default f32 matches the PyTorch module.
    """
    f32 = jnp.float32
    n_node, h_node = node_feat.shape
    n_net, h_net = net_feat.shape
    n_edge, h_pin = pin_feat.shape
    out_node = params["b_nn"].shape[0]
    out_net = params["w_gc"].shape[1]

    # ---- tiling / padding (lane-dense outputs: pad out-feature dims to 128) ----
    out_net_p = _round_up(out_net, 128)
    out_node_p = _round_up(out_node, 128)
    t_net, n_net_p = _row_tile(n_net, row_tile_target)
    t_node, n_node_p = _row_tile(n_node, row_tile_target)
    t_edge, n_edge_p = _row_tile(n_edge, edge_tile_target)

    # ============================ GraphConv ('pins') ============================
    xw_first = out_net <= h_node          # pick matmul order from (raw) shapes
    a_pd = _pad2(a_norm, n_net_p, n_node_p).astype(compute_dtype)
    x_pd = _pad2(node_feat, n_node_p, h_node).astype(compute_dtype)
    w_pd = _pad2(params["w_gc"], h_node, out_net_p).astype(compute_dtype)
    b_pd = _pad2(params["b_gc"].reshape(1, -1), 1, out_net_p).astype(f32)

    gi, gk = n_net_p // t_net, n_node_p // t_node
    acc_cols = out_net_p if xw_first else h_node
    gc_blocks = [(t_net, t_node), (t_node, h_node), (h_node, out_net_p),
                 (1, out_net_p), (t_net, out_net_p)]
    if xw_first:
        gc_flops = (2 * gi * n_node_p * h_node * out_net_p
                    + 2 * n_net_p * n_node_p * out_net_p)
    else:
        gc_flops = (2 * n_net_p * n_node_p * h_node
                    + 2 * n_net_p * h_node * out_net_p)
    gc_bytes = 4 * (n_net_p * n_node_p + gi * n_node_p * h_node
                    + h_node * out_net_p + n_net_p * out_net_p)

    out_net_pd = pl.pallas_call(
        functools.partial(graphconv_kernel, xw_first=xw_first),
        out_shape=jax.ShapeDtypeStruct((n_net_p, out_net_p), f32),
        grid_spec=pltpu.PrefetchScalarGridSpec(
            num_scalar_prefetch=0,
            grid=(gi, gk),
            in_specs=[
                pl.BlockSpec((t_net, t_node), lambda i, k: (i, k)),      # A_norm
                pl.BlockSpec((t_node, h_node), lambda i, k: (k, 0)),     # node_feat
                pl.BlockSpec((h_node, out_net_p), lambda i, k: (0, 0)),  # W
                pl.BlockSpec((1, out_net_p), lambda i, k: (0, 0)),       # b
            ],
            out_specs=pl.BlockSpec((t_net, out_net_p), lambda i, k: (i, 0)),
            scratch_shapes=[pltpu.VMEM((t_net, acc_cols), jnp.float32)],
        ),
        compiler_params=pltpu.CompilerParams(
            dimension_semantics=("parallel", "arbitrary"),
            vmem_limit_bytes=_vmem_limit_bytes(gc_blocks, t_net * acc_cols),
        ),
        cost_estimate=pl.CostEstimate(
            flops=int(gc_flops), transcendentals=0, bytes_accessed=int(gc_bytes)),
    )(a_pd, x_pd, w_pd, b_pd)
    out_net_feat = out_net_pd[:n_net, :out_net]

    # ============================ NNConv ('pinned') =============================
    rep = h_net * out_node
    # lin2 weight with columns permuted to (o, i)-major flat layout.
    w2_t = params["w2"].reshape(h_pin, h_net, out_node) \
                       .transpose(0, 2, 1).reshape(h_pin, rep)
    b2_m = params["b2"].reshape(h_net, out_node)
    # Expansion folded into the gather operand (replaces the old Q kron matmul):
    #   net_rep[n, o*Hnet + i] = net_feat[n, i]
    net_rep = jnp.tile(net_feat, (1, out_node))
    # lin2 bias folded out of the wide elementwise path:  s @ (net @ b2_m).
    net_b2 = net_feat @ b2_m
    # Per-(i,o)-group contraction:  R[(o, i), o'] = (o == o').
    r_t = jnp.kron(jnp.eye(out_node, dtype=f32), jnp.ones((h_net, 1), f32))

    pin_pd = _pad2(pin_feat, n_edge_p, h_pin).astype(compute_dtype)
    w2_pd = _pad2(w2_t, h_pin, rep).astype(compute_dtype)
    s_pd = _pad2(s_gather, n_edge_p, n_net_p).astype(compute_dtype)
    netrep_pd = _pad2(net_rep, n_net_p, rep).astype(compute_dtype)
    netb2_pd = _pad2(net_b2, n_net_p, out_node_p).astype(f32)
    r_pd = _pad2(r_t, rep, out_node_p).astype(f32)
    m_pd = _pad2(m_mean, n_node_p, n_edge_p).astype(compute_dtype)
    bnn_pd = _pad2(params["b_nn"].reshape(1, -1), 1, out_node_p).astype(f32)

    ni, nk = n_node_p // t_node, n_edge_p // t_edge
    nn_blocks = [(t_edge, h_pin), (h_pin, rep), (t_edge, n_net_p), (n_net_p, rep),
                 (n_net_p, out_node_p), (rep, out_node_p), (t_node, t_edge),
                 (1, out_node_p), (t_node, out_node_p)]
    msg_flops = (2 * n_edge_p * h_pin * rep + 2 * n_edge_p * n_net_p * rep
                 + 2 * n_edge_p * rep * out_node_p
                 + 2 * n_edge_p * n_net_p * out_node_p)
    nn_flops = ni * msg_flops + 2 * n_node_p * n_edge_p * out_node_p
    nn_bytes = 4 * (ni * n_edge_p * (h_pin + n_net_p) + n_node_p * n_edge_p
                    + h_pin * rep + n_net_p * (rep + out_node_p)
                    + rep * out_node_p + n_node_p * out_node_p)

    out_node_pd = pl.pallas_call(
        nnconv_kernel,
        out_shape=jax.ShapeDtypeStruct((n_node_p, out_node_p), f32),
        grid_spec=pltpu.PrefetchScalarGridSpec(
            num_scalar_prefetch=0,
            grid=(ni, nk),
            in_specs=[
                pl.BlockSpec((t_edge, h_pin), lambda i, k: (k, 0)),        # pin_feat
                pl.BlockSpec((h_pin, rep), lambda i, k: (0, 0)),           # W2 (o,i)
                pl.BlockSpec((t_edge, n_net_p), lambda i, k: (k, 0)),      # gather
                pl.BlockSpec((n_net_p, rep), lambda i, k: (0, 0)),         # net_rep
                pl.BlockSpec((n_net_p, out_node_p), lambda i, k: (0, 0)),  # net@b2
                pl.BlockSpec((rep, out_node_p), lambda i, k: (0, 0)),      # R
                pl.BlockSpec((t_node, t_edge), lambda i, k: (i, k)),       # mean-scatter
                pl.BlockSpec((1, out_node_p), lambda i, k: (0, 0)),        # b_nn
            ],
            out_specs=pl.BlockSpec((t_node, out_node_p), lambda i, k: (i, 0)),
            scratch_shapes=[pltpu.VMEM((t_node, out_node_p), jnp.float32)],
        ),
        compiler_params=pltpu.CompilerParams(
            dimension_semantics=("parallel", "arbitrary"),
            vmem_limit_bytes=_vmem_limit_bytes(nn_blocks, t_node * out_node_p),
        ),
        cost_estimate=pl.CostEstimate(
            flops=int(nn_flops), transcendentals=0, bytes_accessed=int(nn_bytes)),
    )(pin_pd, w2_pd, s_pd, netrep_pd, netb2_pd, r_pd, m_pd, bnn_pd)
    out_node_feat = out_node_pd[:n_node, :out_node]

    return out_node_feat, out_net_feat


# ----------------------------- pure-JAX reference ----------------------------

def node_net_gnn_reference(node_feat, net_feat, pin_feat,
                           pins_src, pins_dst, pinned_src, pinned_dst, params):
    n_node = node_feat.shape[0]
    n_net = net_feat.shape[0]
    e = pin_feat.shape[0]
    h_net = net_feat.shape[1]
    out_node_feats = params["b_nn"].shape[0]

    # GraphConv (norm='both'), node -> net
    deg_out = jnp.maximum(jnp.zeros((n_node,)).at[pins_src].add(1.0), 1.0)
    deg_in = jnp.maximum(jnp.zeros((n_net,)).at[pins_dst].add(1.0), 1.0)
    fs = node_feat * (deg_out ** -0.5)[:, None]
    agg = jnp.zeros((n_net, node_feat.shape[1])).at[pins_dst].add(fs[pins_src])
    out_net = (agg * (deg_in ** -0.5)[:, None]) @ params["w_gc"] + params["b_gc"]

    # NNConv (aggregator='mean'), net -> node, edge_func = lin2
    w_e = (pin_feat @ params["w2"] + params["b2"]).reshape(e, h_net, out_node_feats)
    hs = net_feat[pinned_src]
    msg = (hs[:, :, None] * w_e).sum(axis=1)
    deg = jnp.maximum(jnp.zeros((n_node,)).at[pinned_dst].add(1.0), 1.0)
    summed = jnp.zeros((n_node, out_node_feats)).at[pinned_dst].add(msg)
    out_node = summed / deg[:, None] + params["b_nn"]
    return out_node, out_net


# ------------------------------------ main -----------------------------------

if __name__ == "__main__":
    # Small shapes consistent with the module's forward.
    N_NODE, N_NET, E = 16, 8, 24
    HIDDEN_NODE, HIDDEN_NET, HIDDEN_PIN = 32, 16, 8
    OUT_NODE, OUT_NET = 8, 16

    key = jax.random.PRNGKey(0)
    ks = jax.random.split(key, 10)

    node_feat = jax.random.normal(ks[0], (N_NODE, HIDDEN_NODE), jnp.float32)
    net_feat = jax.random.normal(ks[1], (N_NET, HIDDEN_NET), jnp.float32)
    pin_feat = jax.random.normal(ks[2], (E, HIDDEN_PIN), jnp.float32)

    # 'pins' edges (node -> net): first N_NODE edges cover every node/net
    # (mirrors DGL's zero-in-degree requirement), remainder random.
    base_src = jnp.arange(N_NODE, dtype=jnp.int32)
    base_dst = jnp.arange(N_NODE, dtype=jnp.int32) % N_NET
    extra_src = jax.random.randint(ks[3], (E - N_NODE,), 0, N_NODE, jnp.int32)
    extra_dst = jax.random.randint(ks[4], (E - N_NODE,), 0, N_NET, jnp.int32)
    pins_src = jnp.concatenate([base_src, extra_src])
    pins_dst = jnp.concatenate([base_dst, extra_dst])
    # 'pinned' edges (net -> node) are the reverse pins; pin_feat is per edge.
    pinned_src, pinned_dst = pins_dst, pins_src

    # Deterministic parameter init (shapes from __init__).
    params = {
        "w_gc": 0.1 * jax.random.normal(ks[5], (HIDDEN_NODE, OUT_NET), jnp.float32),
        "b_gc": 0.1 * jax.random.normal(ks[6], (OUT_NET,), jnp.float32),
        "w2": 0.1 * jax.random.normal(ks[7], (HIDDEN_PIN, HIDDEN_NET * OUT_NODE),
                                      jnp.float32),
        "b2": 0.1 * jax.random.normal(ks[8], (HIDDEN_NET * OUT_NODE,), jnp.float32),
        "b_nn": 0.1 * jax.random.normal(ks[9], (OUT_NODE,), jnp.float32),
    }

    # Graph operators: built once per static graph (amortized across forwards).
    a_norm, s_gather, m_mean = build_graph_operators(
        N_NODE, N_NET, pins_src, pins_dst, pinned_src, pinned_dst)

    fwd = jax.jit(node_net_gnn_forward)
    out_node, out_net = fwd(node_feat, net_feat, pin_feat,
                            a_norm, s_gather, m_mean, params)
    jax.block_until_ready((out_node, out_net))

    ref_node, ref_net = node_net_gnn_reference(
        node_feat, net_feat, pin_feat, pins_src, pins_dst,
        pinned_src, pinned_dst, params)

    assert out_node.shape == (N_NODE, OUT_NODE)
    assert out_net.shape == (N_NET, OUT_NET)
    assert jnp.allclose(out_node, ref_node, rtol=1e-4, atol=1e-4)
    assert jnp.allclose(out_net, ref_net, rtol=1e-4, atol=1e-4)

    print("KERNEL_OK")
</pallas_src>

<mosaic_0001>
module attributes {stable_mosaic.version = 11 : i64} {
  func.func @nnconv_kernel(%arg0: i32, %arg1: i32, %arg2: memref<24x8xf32, #tpu.memory_space<vmem>>, %arg3: memref<8x128xf32, #tpu.memory_space<vmem>>, %arg4: memref<24x8xf32, #tpu.memory_space<vmem>>, %arg5: memref<8x128xf32, #tpu.memory_space<vmem>>, %arg6: memref<8x128xf32, #tpu.memory_space<vmem>>, %arg7: memref<128x128xf32, #tpu.memory_space<vmem>>, %arg8: memref<16x24xf32, #tpu.memory_space<vmem>>, %arg9: memref<1x128xf32, #tpu.memory_space<vmem>>, %arg10: memref<16x128xf32, #tpu.memory_space<vmem>>, %arg11: memref<16x128xf32, #tpu.memory_space<vmem>>) attributes {dimension_semantics = [#tpu.dimension_semantics<parallel>, #tpu.dimension_semantics<arbitrary>], iteration_bounds = array<i64: 1, 1>, scalar_prefetch = 0 : i64, scratch_operands = 1 : i64, tpu.core_type = #tpu.core_type<tc>, window_params = [{transform_indices = @transform_0, window_bounds = array<i64: 24, 8>}, {pipeline_mode = #tpu.pipeline_mode<synchronous>, transform_indices = @transform_1, window_bounds = array<i64: 8, 128>}, {transform_indices = @transform_2, window_bounds = array<i64: 24, 8>}, {pipeline_mode = #tpu.pipeline_mode<synchronous>, transform_indices = @transform_3, window_bounds = array<i64: 8, 128>}, {pipeline_mode = #tpu.pipeline_mode<synchronous>, transform_indices = @transform_4, window_bounds = array<i64: 8, 128>}, {pipeline_mode = #tpu.pipeline_mode<synchronous>, transform_indices = @transform_5, window_bounds = array<i64: 128, 128>}, {transform_indices = @transform_6, window_bounds = array<i64: 16, 24>}, {pipeline_mode = #tpu.pipeline_mode<synchronous>, transform_indices = @transform_7, window_bounds = array<i64: 1, 128>}, {transform_indices = @transform_8, window_bounds = array<i64: 16, 128>}]} {
    %c0_i32 = arith.constant 0 : i32
    %0 = arith.cmpi eq, %arg1, %c0_i32 : i32
    %1 = arith.extui %0 : i1 to i32
    %c0_i32_0 = arith.constant 0 : i32
    %2 = arith.cmpi ne, %1, %c0_i32_0 : i32
    scf.if %2 {
      %cst_26 = arith.constant 0.000000e+00 : f32
      %24 = vector.broadcast %cst_26 : f32 to vector<16x128xf32>
      %c0_27 = arith.constant 0 : index
      %c0_28 = arith.constant 0 : index
      %25 = vector.load %arg11[%c0_27, %c0_28] : memref<16x128xf32, #tpu.memory_space<vmem>>, vector<16x128xf32>
      tpu.vector_store %arg11[%c0_27, %c0_28], %24 {strides = array<i32>} : memref<16x128xf32, #tpu.memory_space<vmem>>, vector<16x128xf32>,
    } else {
    }
    %c0 = arith.constant 0 : index
    %c0_1 = arith.constant 0 : index
    %3 = vector.load %arg2[%c0, %c0_1] : memref<24x8xf32, #tpu.memory_space<vmem>>, vector<24x8xf32>
    %c0_2 = arith.constant 0 : index
    %c0_3 = arith.constant 0 : index
    %4 = vector.load %arg3[%c0_2, %c0_3] : memref<8x128xf32, #tpu.memory_space<vmem>>, vector<8x128xf32>
    %cst = arith.constant dense<0.000000e+00> : vector<24x128xf32>
    %5 = tpu.matmul %3, %4, %cst {dimension_numbers = #tpu.dot_dimension_numbers<[1], [0], [0], [1], [0, 0, 1, 1], [], []>} : vector<24x8xf32>, vector<8x128xf32>, vector<24x128xf32> -> vector<24x128xf32>
    %c0_4 = arith.constant 0 : index
    %c0_5 = arith.constant 0 : index
    %6 = vector.load %arg4[%c0_4, %c0_5] : memref<24x8xf32, #tpu.memory_space<vmem>>, vector<24x8xf32>
    %c0_6 = arith.constant 0 : index
    %c0_7 = arith.constant 0 : index
    %7 = vector.load %arg5[%c0_6, %c0_7] : memref<8x128xf32, #tpu.memory_space<vmem>>, vector<8x128xf32>
    %cst_8 = arith.constant dense<0.000000e+00> : vector<24x128xf32>
    %8 = tpu.matmul %6, %7, %cst_8 {dimension_numbers = #tpu.dot_dimension_numbers<[1], [0], [0], [1], [0, 0, 1, 1], [], []>} : vector<24x8xf32>, vector<8x128xf32>, vector<24x128xf32> -> vector<24x128xf32>
    %9 = arith.mulf %8, %5 : vector<24x128xf32>
    %c0_9 = arith.constant 0 : index
    %c0_10 = arith.constant 0 : index
    %10 = vector.load %arg7[%c0_9, %c0_10] : memref<128x128xf32, #tpu.memory_space<vmem>>, vector<128x128xf32>
    %cst_11 = arith.constant dense<0.000000e+00> : vector<24x128xf32>
    %11 = tpu.matmul %9, %10, %cst_11 {dimension_numbers = #tpu.dot_dimension_numbers<[1], [0], [0], [1], [0, 0, 1, 1], [], []>} : vector<24x128xf32>, vector<128x128xf32>, vector<24x128xf32> -> vector<24x128xf32>
    %c0_12 = arith.constant 0 : index
    %c0_13 = arith.constant 0 : index
    %12 = vector.load %arg4[%c0_12, %c0_13] : memref<24x8xf32, #tpu.memory_space<vmem>>, vector<24x8xf32>
    %c0_14 = arith.constant 0 : index
    %c0_15 = arith.constant 0 : index
    %13 = vector.load %arg6[%c0_14, %c0_15] : memref<8x128xf32, #tpu.memory_space<vmem>>, vector<8x128xf32>
    %cst_16 = arith.constant dense<0.000000e+00> : vector<24x128xf32>
    %14 = tpu.matmul %12, %13, %cst_16 {dimension_numbers = #tpu.dot_dimension_numbers<[1], [0], [0], [1], [0, 0, 1, 1], [], []>} : vector<24x8xf32>, vector<8x128xf32>, vector<24x128xf32> -> vector<24x128xf32>
    %15 = arith.addf %11, %14 : vector<24x128xf32>
    %c0_17 = arith.constant 0 : index
    %c0_18 = arith.constant 0 : index
    %16 = vector.load %arg11[%c0_17, %c0_18] : memref<16x128xf32, #tpu.memory_space<vmem>>, vector<16x128xf32>
    %c0_19 = arith.constant 0 : index
    %c0_20 = arith.constant 0 : index
    %17 = vector.load %arg8[%c0_19, %c0_20] : memref<16x24xf32, #tpu.memory_space<vmem>>, vector<16x24xf32>
    %cst_21 = arith.constant dense<0.000000e+00> : vector<16x128xf32>
    %18 = tpu.matmul %17, %15, %cst_21 {dimension_numbers = #tpu.dot_dimension_numbers<[1], [0], [0], [1], [0, 0, 1, 1], [], []>} : vector<16x24xf32>, vector<24x128xf32>, vector<16x128xf32> -> vector<16x128xf32>
    %19 = arith.addf %16, %18 : vector<16x128xf32>
    %c0_22 = arith.constant 0 : index
    %c0_23 = arith.constant 0 : index
    %20 = vector.load %arg11[%c0_22, %c0_23] : memref<16x128xf32, #tpu.memory_space<vmem>>, vector<16x128xf32>
    tpu.vector_store %arg11[%c0_22, %c0_23], %19 {strides = array<i32>} : memref<16x128xf32, #tpu.memory_space<vmem>>, vector<16x128xf32>,
    %c0_i32_24 = arith.constant 0 : i32
    %21 = arith.cmpi eq, %arg1, %c0_i32_24 : i32
    %22 = arith.extui %21 : i1 to i32
    %c0_i32_25 = arith.constant 0 : i32
    %23 = arith.cmpi ne, %22, %c0_i32_25 : i32
    scf.if %23 {
      %c0_26 = arith.constant 0 : index
      %c0_27 = arith.constant 0 : index
      %24 = vector.load %arg11[%c0_26, %c0_27] : memref<16x128xf32, #tpu.memory_space<vmem>>, vector<16x128xf32>
      %c0_28 = arith.constant 0 : index
      %c0_29 = arith.constant 0 : index
      %25 = vector.load %arg9[%c0_28, %c0_29] : memref<1x128xf32, #tpu.memory_space<vmem>>, vector<1x128xf32>
      %26 = vector.broadcast %25 : vector<1x128xf32> to vector<16x128xf32>
      %27 = arith.addf %24, %26 : vector<16x128xf32>
      %c0_30 = arith.constant 0 : index
      %c0_31 = arith.constant 0 : index
      %28 = vector.load %arg10[%c0_30, %c0_31] : memref<16x128xf32, #tpu.memory_space<vmem>>, vector<16x128xf32>
      tpu.vector_store %arg10[%c0_30, %c0_31], %27 {strides = array<i32>} : memref<16x128xf32, #tpu.memory_space<vmem>>, vector<16x128xf32>,
    } else {
    }
    return
  }
  func.func @transform_0(%arg0: i32, %arg1: i32) -> (i32, i32) {
    %c0_i32 = arith.constant 0 : i32
    %c0_i32_0 = arith.constant 0 : i32
    return %arg1, %c0_i32 : i32, i32
  }
  func.func @transform_1(%arg0: i32, %arg1: i32) -> (i32, i32) {
    %c0_i32 = arith.constant 0 : i32
    %c0_i32_0 = arith.constant 0 : i32
    %c0_i32_1 = arith.constant 0 : i32
    return %c0_i32, %c0_i32_0 : i32, i32
  }
  func.func @transform_2(%arg0: i32, %arg1: i32) -> (i32, i32) {
    %c0_i32 = arith.constant 0 : i32
    %c0_i32_0 = arith.constant 0 : i32
    return %arg1, %c0_i32 : i32, i32
  }
  func.func @transform_3(%arg0: i32, %arg1: i32) -> (i32, i32) {
    %c0_i32 = arith.constant 0 : i32
    %c0_i32_0 = arith.constant 0 : i32
    %c0_i32_1 = arith.constant 0 : i32
    return %c0_i32, %c0_i32_0 : i32, i32
  }
  func.func @transform_4(%arg0: i32, %arg1: i32) -> (i32, i32) {
    %c0_i32 = arith.constant 0 : i32
    %c0_i32_0 = arith.constant 0 : i32
    %c0_i32_1 = arith.constant 0 : i32
    return %c0_i32, %c0_i32_0 : i32, i32
  }
  func.func @transform_5(%arg0: i32, %arg1: i32) -> (i32, i32) {
    %c0_i32 = arith.constant 0 : i32
    %c0_i32_0 = arith.constant 0 : i32
    %c0_i32_1 = arith.constant 0 : i32
    return %c0_i32, %c0_i32_0 : i32, i32
  }
  func.func @transform_6(%arg0: i32, %arg1: i32) -> (i32, i32) {
    %c0_i32 = arith.constant 0 : i32
    return %arg0, %arg1 : i32, i32
  }
  func.func @transform_7(%arg0: i32, %arg1: i32) -> (i32, i32) {
    %c0_i32 = arith.constant 0 : i32
    %c0_i32_0 = arith.constant 0 : i32
    %c0_i32_1 = arith.constant 0 : i32
    return %c0_i32, %c0_i32_0 : i32, i32
  }
  func.func @transform_8(%arg0: i32, %arg1: i32) -> (i32, i32) {
    %c0_i32 = arith.constant 0 : i32
    %c0_i32_0 = arith.constant 0 : i32
    return %arg0, %c0_i32 : i32, i32
  }
}

module attributes {stable_mosaic.version = 11 : i64} {
  func.func @graphconv_kernel(%arg0: i32, %arg1: i32, %arg2: memref<8x16xf32, #tpu.memory_space<vmem>>, %arg3: memref<16x32xf32, #tpu.memory_space<vmem>>, %arg4: memref<32x128xf32, #tpu.memory_space<vmem>>, %arg5: memref<1x128xf32, #tpu.memory_space<vmem>>, %arg6: memref<8x128xf32, #tpu.memory_space<vmem>>, %arg7: memref<8x128xf32, #tpu.memory_space<vmem>>) attributes {dimension_semantics = [#tpu.dimension_semantics<parallel>, #tpu.dimension_semantics<arbitrary>], iteration_bounds = array<i64: 1, 1>, scalar_prefetch = 0 : i64, scratch_operands = 1 : i64, tpu.core_type = #tpu.core_type<tc>, window_params = [{transform_indices = @transform_0, window_bounds = array<i64: 8, 16>}, {transform_indices = @transform_1, window_bounds = array<i64: 16, 32>}, {pipeline_mode = #tpu.pipeline_mode<synchronous>, transform_indices = @transform_2, window_bounds = array<i64: 32, 128>}, {pipeline_mode = #tpu.pipeline_mode<synchronous>, transform_indices = @transform_3, window_bounds = array<i64: 1, 128>}, {transform_indices = @transform_4, window_bounds = array<i64: 8, 128>}]} {
    %c0_i32 = arith.constant 0 : i32
    %0 = arith.cmpi eq, %arg1, %c0_i32 : i32
    %1 = arith.extui %0 : i1 to i32
    %c0_i32_0 = arith.constant 0 : i32
    %2 = arith.cmpi ne, %1, %c0_i32_0 : i32
    scf.if %2 {
      %cst_13 = arith.constant 0.000000e+00 : f32
      %14 = vector.broadcast %cst_13 : f32 to vector<8x128xf32>
      %c0_14 = arith.constant 0 : index
      %c0_15 = arith.constant 0 : index
      %15 = vector.load %arg7[%c0_14, %c0_15] : memref<8x128xf32, #tpu.memory_space<vmem>>, vector<8x128xf32>
      tpu.vector_store %arg7[%c0_14, %c0_15], %14 {strides = array<i32>} : memref<8x128xf32, #tpu.memory_space<vmem>>, vector<8x128xf32>,
    } else {
    }
    %c0 = arith.constant 0 : index
    %c0_1 = arith.constant 0 : index
    %3 = vector.load %arg3[%c0, %c0_1] : memref<16x32xf32, #tpu.memory_space<vmem>>, vector<16x32xf32>
    %c0_2 = arith.constant 0 : index
    %c0_3 = arith.constant 0 : index
    %4 = vector.load %arg4[%c0_2, %c0_3] : memref<32x128xf32, #tpu.memory_space<vmem>>, vector<32x128xf32>
    %cst = arith.constant dense<0.000000e+00> : vector<16x128xf32>
    %5 = tpu.matmul %3, %4, %cst {dimension_numbers = #tpu.dot_dimension_numbers<[1], [0], [0], [1], [0, 0, 1, 1], [], []>} : vector<16x32xf32>, vector<32x128xf32>, vector<16x128xf32> -> vector<16x128xf32>
    %c0_4 = arith.constant 0 : index
    %c0_5 = arith.constant 0 : index
    %6 = vector.load %arg7[%c0_4, %c0_5] : memref<8x128xf32, #tpu.memory_space<vmem>>, vector<8x128xf32>
    %c0_6 = arith.constant 0 : index
    %c0_7 = arith.constant 0 : index
    %7 = vector.load %arg2[%c0_6, %c0_7] : memref<8x16xf32, #tpu.memory_space<vmem>>, vector<8x16xf32>
    %cst_8 = arith.constant dense<0.000000e+00> : vector<8x128xf32>
    %8 = tpu.matmul %7, %5, %cst_8 {dimension_numbers = #tpu.dot_dimension_numbers<[1], [0], [0], [1], [0, 0, 1, 1], [], []>} : vector<8x16xf32>, vector<16x128xf32>, vector<8x128xf32> -> vector<8x128xf32>
    %9 = arith.addf %6, %8 : vector<8x128xf32>
    %c0_9 = arith.constant 0 : index
    %c0_10 = arith.constant 0 : index
    %10 = vector.load %arg7[%c0_9, %c0_10] : memref<8x128xf32, #tpu.memory_space<vmem>>, vector<8x128xf32>
    tpu.vector_store %arg7[%c0_9, %c0_10], %9 {strides = array<i32>} : memref<8x128xf32, #tpu.memory_space<vmem>>, vector<8x128xf32>,
    %c0_i32_11 = arith.constant 0 : i32
    %11 = arith.cmpi eq, %arg1, %c0_i32_11 : i32
    %12 = arith.extui %11 : i1 to i32
    %c0_i32_12 = arith.constant 0 : i32
    %13 = arith.cmpi ne, %12, %c0_i32_12 : i32
    scf.if %13 {
      %c0_13 = arith.constant 0 : index
      %c0_14 = arith.constant 0 : index
      %14 = vector.load %arg7[%c0_13, %c0_14] : memref<8x128xf32, #tpu.memory_space<vmem>>, vector<8x128xf32>
      %c0_15 = arith.constant 0 : index
      %c0_16 = arith.constant 0 : index
      %15 = vector.load %arg5[%c0_15, %c0_16] : memref<1x128xf32, #tpu.memory_space<vmem>>, vector<1x128xf32>
      %16 = vector.broadcast %15 : vector<1x128xf32> to vector<8x128xf32>
      %17 = arith.addf %14, %16 : vector<8x128xf32>
      %c0_17 = arith.constant 0 : index
      %c0_18 = arith.constant 0 : index
      %18 = vector.load %arg6[%c0_17, %c0_18] : memref<8x128xf32, #tpu.memory_space<vmem>>, vector<8x128xf32>
      tpu.vector_store %arg6[%c0_17, %c0_18], %17 {strides = array<i32>} : memref<8x128xf32, #tpu.memory_space<vmem>>, vector<8x128xf32>,
    } else {
    }
    return
  }
  func.func @transform_0(%arg0: i32, %arg1: i32) -> (i32, i32) {
    %c0_i32 = arith.constant 0 : i32
    return %arg0, %arg1 : i32, i32
  }
  func.func @transform_1(%arg0: i32, %arg1: i32) -> (i32, i32) {
    %c0_i32 = arith.constant 0 : i32
    %c0_i32_0 = arith.constant 0 : i32
    return %arg1, %c0_i32 : i32, i32
  }
  func.func @transform_2(%arg0: i32, %arg1: i32) -> (i32, i32) {
    %c0_i32 = arith.constant 0 : i32
    %c0_i32_0 = arith.constant 0 : i32
    %c0_i32_1 = arith.constant 0 : i32
    return %c0_i32, %c0_i32_0 : i32, i32
  }
  func.func @transform_3(%arg0: i32, %arg1: i32) -> (i32, i32) {
    %c0_i32 = arith.constant 0 : i32
    %c0_i32_0 = arith.constant 0 : i32
    %c0_i32_1 = arith.constant 0 : i32
    return %c0_i32, %c0_i32_0 : i32, i32
  }
  func.func @transform_4(%arg0: i32, %arg1: i32) -> (i32, i32) {
    %c0_i32 = arith.constant 0 : i32
    %c0_i32_0 = arith.constant 0 : i32
    return %arg0, %c0_i32 : i32, i32
  }
}

</mosaic_0001>

<bundles_post_ra>
// kernel: node_net_gnn_forward.2
= control target key start
LH: loop header
LB: loop body
LE: loop exit
PB: predicated region body
PF: predicated region fallthrough
CT: control target
= control target key end

     0   :  { %vm29_vm0 = vcmask 261120   ;;  %s351_s0 = inlined_call_operand.vmem [shape: f32[8,16], index: 0, kind: input, shape index: {}]   ;;  %s352_s1 = inlined_call_operand.vmem [shape: f32[16,32], index: 1, kind: input, shape index: {}]   ;;  %s353_s2 = inlined_call_operand.vmem [shape: f32[32,128], index: 2, kind: input, shape index: {}]   ;;  %s354_s3 = inlined_call_operand.vmem [shape: f32[1,128], index: 3, kind: input, shape index: {}]   ;;  %s355_s4 = inlined_call_operand.hbm [shape: f32[8,128], index: 4, kind: output, shape index: {}]  }
   0x1   :  { %v25_v0 = vld [vmem:[%s353_s2] sm:$0xff]  ;;  %v26_v1 = vld [vmem:[%s353_s2 + $0x8] sm:$0xff]  ;;  %v27_v2 = vld [vmem:[%s353_s2 + $0x10] sm:$0xff] }
   0x2   :  { %v247_v3 = vpack.c.bf16 %v26_v1, %v25_v0  ;;  %v28_v4 = vld [vmem:[%s353_s2 + $0x18] sm:$0xff]  ;;  %v23_v5 = vld [vmem:[%s352_s1] sm:$0xff] }
   0x3   :  { %v251_v6 = vpack.c.bf16 %v28_v4, %v27_v2  ;;  %237 = vmatprep.mubr.msk.f32.mxu0 %vm29_vm0, %v23_v5 }
   0x4   :  { %9 = vsyncpa [#allocation4], 0  ;;  %248 = vmatprep.subr.bf16.mxu0 %v247_v3  ;;  %v24_v7 = vld [vmem:[%s352_s1 + $0x8] sm:$0xff]  ;;  %v286_v8 = vmov 0.0|0.0   ;;  %vm287_vm1 = vmmov 0   ;;  %v288_v9 = vmov 0.0  }
   0x5   :  { %250 = vmatpush3.bf16.msra.mxu0 %v247_v3  ;;  %255 = vmatprep.subr.bf16.mxu1 %v286_v8  ;;  %v112_v13 = vld [vmem:[%s351_s0] sm:$0xff]  ;;  %vm113_vm2 = vcmask 130048   ;;  %s289_s1 = smov [#allocation3]  }
   0x6   :  { %252 = vmatprep.subr.bf16.mxu0 %v251_v6  ;;  %244 = vmatprep.mubr.msk.f32.mxu1 %vm287_vm1, %v288_v9  ;;  %v219_v14 = vld [vmem:[%s354_s3] ss:$0 sm:$0xff]  ;;  %s208_s30 = sshll.u32 %s289_s1, 4  ;;  %s209_s30 = int_to_ptr.vmem [resolvable:$true] %s208_s30 }
   0x7   :  { %s262_s5 = scalar_lea.vmem %s209_s30, 128  ;;  %p267_p1 = scmp.lt.s32.totalorder %s209_s30, %s209_s30 }
   0x8   :  { %p263_p0 = scmp.ne.s32.totalorder %s209_s30, %s262_s5  ;;  %p268_p2 = scmp.lt.s32.totalorder %s262_s5, %s262_s5 }
   0x9   :  { %254 = vmatpush3.bf16.msra.mxu0 %v251_v6 }
   0xa   :  { %p269_p3 = por %p268_p2, %p267_p1 }
   0xc   :  { %238 = vmatmul.mubr.msk.f32.vlgmr.msra.gmra.mrb[0].mxu0 %vm29_vm0, %v24_v7  ;;  %p270_p4 = pnand %p269_p3, %p263_p0 }
  0xdf   :  { %v239_v10 = vpop.f32.mrb[0].mxu0 }
  0xe0   :  { %v102_v11 = vpop.f32.mrb[1].mxu0 }
  0xe1   :  { %v256_v12 = vpack.c.bf16 %v239_v10, %v102_v11 }
  0xe3   :  { %257 = vmatpush3.bf16.msra.mxu1 %v256_v12 }
  0xe6   :  { %245 = vmatmul.mubr.msk.f32.vlgmr.msra.gmra.mrb[0].mxu1 %vm113_vm2, %v112_v13 }
 0x1b9   :  { %v183_v15 = vpop.f32.mrb[0].mxu1 }
 0x1ba   :  { %v200_v16 = vadd.f32 %v219_v14, %v183_v15  ;;  %v246_v17 = vpop.f32.mrb[1].mxu1 }
 0x1bc   :  { %201 = vst [vmem:[#allocation3] sm:$0xff] %v200_v16 }
 0x1bd   :  { %273 = shalt.err (!%p270_p4)
}
 0x1be   :  { %s274_s7 = scalar_lea.hbm %s355_s4, 128 }
 0x1bf   :  { %p275_p5 = scmp.ne.s32.totalorder %s355_s4, %s274_s7  ;;  %p278_p6 = scmp.lt.u32.totalorder %s274_s7, %s355_s4 }
 0x1c1   :  { %p280_p7 = pnand %p278_p6, %p275_p5 }
 0x1c3   :  { %283 = shalt.err (!%p280_p7)
}
 0x1c4   :  { %211 = dma.vmem_to_hbm [thread:$0]  %s209_s30, 128, %s355_s4, [#allocation4]  }
 0x1c5   :  { %284 = dma.done.wait [#allocation4], 128  }
 0x1c6   :  { %285 = vsyncadd [#allocation4], 4294967168 }
 0x1c7   :  { %215 = vsyncpa [#allocation4], 1 }

// kernel: node_net_gnn_forward.3
= control target key start
LH: loop header
LB: loop body
LE: loop exit
PB: predicated region body
PF: predicated region fallthrough
CT: control target
= control target key end

     0   :  { %vm39_vm0 = vcmask 64512   ;;  %v677_v0 = vmov 0.0   ;;  %vm678_vm1 = vmmov 0   ;;  %v679_v4 = vmov 0.0|0.0   ;;  %s853_s1 = inlined_call_operand.vmem [shape: f32[8,128], index: 1, kind: input, shape index: {}]   ;;  %s854_s0 = inlined_call_operand.vmem [shape: f32[24,8], index: 0, kind: input, shape index: {}]   ;;  %s855_s3 = inlined_call_operand.vmem [shape: f32[8,128], index: 3, kind: input, shape index: {}]   ;;  %s856_s5 = inlined_call_operand.vmem [shape: f32[128,128], index: 5, kind: input, shape index: {}]   ;;  %s857_s2 = inlined_call_operand.vmem [shape: f32[24,8], index: 2, kind: input, shape index: {}]   ;;  %s858_s4 = inlined_call_operand.vmem [shape: f32[8,128], index: 4, kind: input, shape index: {}]   ;;  %s859_s6 = inlined_call_operand.vmem [shape: f32[16,24], index: 6, kind: input, shape index: {}]   ;;  %s860_s7 = inlined_call_operand.vmem [shape: f32[1,128], index: 7, kind: input, shape index: {}]   ;;  %s861_s8 = inlined_call_operand.vmem [shape: f32[16,128], index: 8, kind: output, shape index: {}]  }
   0x1   :  { %560 = vmatprep.subr.mxu1 %v677_v0  ;;  %v38_v1 = vld [vmem:[%s853_s1] sm:$0xff]  ;;  %562 = vmatprep.mubr.msk.f32.mxu1 %vm678_vm1, %v677_v0  ;;  %v36_v5 = vld [vmem:[%s854_s0 + $0x8] sm:$0xff]  ;;  %v227_v8 = vld [vmem:[%s856_s5 + $0x10] sm:$0xff]  ;;  %vm406_vm2 = vcmask 195584  }
   0x2   :  { %v35_v2 = vld [vmem:[%s854_s0] sm:$0xff]  ;;  %561 = vmatpush3.msra.mxu1 %v38_v1  ;;  %643 = vmatprep.subr.bf16.mxu0 %v679_v4  ;;  %v226_v7 = vld [vmem:[%s856_s5 + $0x8] sm:$0xff]  ;;  %v228_v9 = vld [vmem:[%s856_s5 + $0x18] sm:$0xff] }
   0x3   :  { %v132_v3 = vld [vmem:[%s855_s3] sm:$0xff]  ;;  %563 = vmatmul.mubr.msk.f32.vlgmr.msra.gmra.mrb[0].mxu1 %vm39_vm0, %v35_v2  ;;  %571 = vmatprep.subr.mxu1 %v677_v0  ;;  %v647_v11 = vpack.c.bf16 %v228_v9, %v227_v8  ;;  %v37_v12 = vld [vmem:[%s854_s0 + $0x10] sm:$0xff]  ;;  %v230_v14 = vld [vmem:[%s856_s5 + $0x28] sm:$0xff] }
   0x4   :  { %v225_v6 = vld [vmem:[%s856_s5] sm:$0xff]  ;;  %565 = vmatprep.mubr.msk.f32.mxu1 %vm678_vm1, %v677_v0  ;;  %572 = vmatpush3.msra.mxu1 %v132_v3  ;;  %v231_v17 = vld [vmem:[%s856_s5 + $0x30] sm:$0xff]  ;;  %v232_v18 = vld [vmem:[%s856_s5 + $0x38] sm:$0xff] }
   0x5   :  { %v644_v10 = vpack.c.bf16 %v226_v7, %v225_v6  ;;  %582 = vmatprep.subr.mxu1 %v677_v0  ;;  %625 = vmatprep.mubr.msk.f32.mxu0 %vm678_vm1, %v677_v0  ;;  %v229_v13 = vld [vmem:[%s856_s5 + $0x20] sm:$0xff]  ;;  %v653_v19 = vpack.c.bf16 %v232_v18, %v231_v17  ;;  %v130_v20 = vld [vmem:[%s857_s2 + $0x8] sm:$0xff]  ;;  %v131_v21 = vld [vmem:[%s857_s2 + $0x10] sm:$0xff] }
   0x6   :  { %v650_v15 = vpack.c.bf16 %v230_v14, %v229_v13  ;;  %v129_v16 = vld [vmem:[%s857_s2] sm:$0xff]  ;;  %v234_v23 = vld [vmem:[%s856_s5 + $0x48] sm:$0xff]  ;;  %v235_v25 = vld [vmem:[%s856_s5 + $0x50] sm:$0xff] }
   0x7   :  { %566 = vmatmul.mubr.msk.f32.gmra.mrb[2].mxu1 %vm39_vm0, %v36_v5  ;;  %645 = vmatpush3.bf16.msra.mxu0 %v644_v10  ;;  %v233_v22 = vld [vmem:[%s856_s5 + $0x40] sm:$0xff]  ;;  %v236_v26 = vld [vmem:[%s856_s5 + $0x58] sm:$0xff]  ;;  %v238_v29 = vld [vmem:[%s856_s5 + $0x68] sm:$0xff] }
   0x8   :  { %568 = vmatprep.mubr.msk.f32.mxu1 %vm678_vm1, %v677_v0  ;;  %646 = vmatprep.subr.bf16.mxu0 %v679_v4  ;;  %v656_v24 = vpack.c.bf16 %v234_v23, %v233_v22  ;;  %v659_v27 = vpack.c.bf16 %v236_v26, %v235_v25  ;;  %v237_v28 = vld [vmem:[%s856_s5 + $0x60] sm:$0xff]  ;;  %v239_v31 = vld [vmem:[%s856_s5 + $0x70] sm:$0xff]  ;;  %v240_v32 = vld [vmem:[%s856_s5 + $0x78] sm:$0xff] }
   0x9   :  { %v662_v30 = vpack.c.bf16 %v238_v29, %v237_v28  ;;  %v241_v33 = vld [vmem:[%s858_s4] sm:$0xff]  ;;  %v665_v34 = vpack.c.bf16 %v240_v32, %v239_v31  ;;  %v405_v3 = vld [vmem:[%s859_s6 + $0x8] sm:$0xff] }
   0xa   :  { %v404_v56 = vld [vmem:[%s859_s6] sm:$0xff] }
   0xb   :  { %569 = vmatmul.mubr.msk.f32.gmra.mrb[4].mxu1 %vm39_vm0, %v37_v12  ;;  %648 = vmatpush3.bf16.msra.mxu0 %v647_v11 }
   0xc   :  { %573 = vmatprep.mubr.msk.f32.mxu1 %vm678_vm1, %v677_v0  ;;  %649 = vmatprep.subr.bf16.mxu0 %v679_v4 }
   0xf   :  { %574 = vmatmul.mubr.msk.f32.vlgmr.msra.gmra.mrb[6].mxu1 %vm39_vm0, %v129_v16  ;;  %651 = vmatpush3.bf16.msra.mxu0 %v650_v15 }
  0x10   :  { %576 = vmatprep.mubr.msk.f32.mxu1 %vm678_vm1, %v677_v0  ;;  %652 = vmatprep.subr.bf16.mxu0 %v679_v4 }
  0x11   :  { %583 = vmatpush3.msra.mxu1 %v241_v33 }
  0x13   :  { %577 = vmatmul.mubr.msk.f32.gmra.mrb[8].mxu1 %vm39_vm0, %v130_v20  ;;  %654 = vmatpush3.bf16.msra.mxu0 %v653_v19 }
  0x14   :  { %579 = vmatprep.mubr.msk.f32.mxu1 %vm678_vm1, %v677_v0  ;;  %655 = vmatprep.subr.bf16.mxu0 %v679_v4 }
  0x17   :  { %580 = vmatmul.mubr.msk.f32.gmra.mrb[10].mxu1 %vm39_vm0, %v131_v21  ;;  %657 = vmatpush3.bf16.msra.mxu0 %v656_v24 }
  0x18   :  { %584 = vmatprep.mubr.msk.f32.mxu1 %vm678_vm1, %v677_v0  ;;  %658 = vmatprep.subr.bf16.mxu0 %v679_v4 }
  0x1b   :  { %660 = vmatpush3.bf16.msra.mxu0 %v659_v27  ;;  %585 = vmatmul.mubr.msk.f32.vlgmr.msra.gmra.mrb[12].mxu1 %vm39_vm0, %v129_v16 }
  0x1c   :  { %661 = vmatprep.subr.bf16.mxu0 %v679_v4  ;;  %587 = vmatprep.mubr.msk.f32.mxu1 %vm678_vm1, %v677_v0 }
  0x1f   :  { %663 = vmatpush3.bf16.msra.mxu0 %v662_v30  ;;  %588 = vmatmul.mubr.msk.f32.gmra.mrb[14].mxu1 %vm39_vm0, %v130_v20 }
  0x20   :  { %664 = vmatprep.subr.bf16.mxu0 %v679_v4  ;;  %590 = vmatprep.mubr.msk.f32.mxu1 %vm678_vm1, %v677_v0  ;;  %v523_v4 = vld [vmem:[%s860_s7] ss:$0 sm:$0xff] }
  0x23   :  { %666 = vmatpush3.bf16.msra.mxu0 %v665_v34  ;;  %591 = vmatmul.mubr.msk.f32.gmra.mrb[16].mxu1 %vm39_vm0, %v131_v21 }
  0x24   :  { %640 = vmatprep.mubr.msk.f32.mxu1 %vm406_vm2, %v404_v56 }
  0xd6   :  { %v115_v35 = vpop.f32.mrb[0].mxu1 }
  0xd7   :  { %v564_v36 = vpop.f32.mrb[1].mxu1 }
  0xda   :  { %v120_v37 = vpop.f32.mrb[2].mxu1 }
  0xdb   :  { %v567_v38 = vpop.f32.mrb[3].mxu1 }
  0xde   :  { %v125_v39 = vpop.f32.mrb[4].mxu1 }
  0xdf   :  { %v570_v40 = vpop.f32.mrb[5].mxu1 }
  0xe2   :  { %v208_v41 = vpop.f32.mrb[6].mxu1 }
  0xe3   :  { %v222_v42 = vmul.f32 %v208_v41, %v115_v35  ;;  %v575_v43 = vpop.f32.mrb[7].mxu1 }
  0xe5   :  { %626 = vmatmul.mubr.f32.vlgmr.msra.gmra.mrb[0].mxu0 %v222_v42 }
  0xe6   :  { %v213_v44 = vpop.f32.mrb[8].mxu1  ;;  %628 = vmatprep.mubr.msk.f32.mxu0 %vm678_vm1, %v677_v0 }
  0xe7   :  { %v223_v45 = vmul.f32 %v213_v44, %v120_v37  ;;  %v578_v46 = vpop.f32.mrb[9].mxu1 }
  0xe9   :  { %629 = vmatmul.mubr.f32.gmra.mrb[2].mxu0 %v223_v45 }
  0xea   :  { %v218_v47 = vpop.f32.mrb[10].mxu1  ;;  %631 = vmatprep.mubr.msk.f32.mxu0 %vm678_vm1, %v677_v0 }
  0xeb   :  { %v224_v48 = vmul.f32 %v218_v47, %v125_v39  ;;  %v581_v49 = vpop.f32.mrb[11].mxu1 }
  0xed   :  { %632 = vmatmul.mubr.f32.gmra.mrb[4].mxu0 %v224_v48 }
  0xee   :  { %v308_v50 = vpop.f32.mrb[12].mxu1 }
  0xef   :  { %v586_v51 = vpop.f32.mrb[13].mxu1 }
  0xf2   :  { %v313_v52 = vpop.f32.mrb[14].mxu1 }
  0xf3   :  { %v589_v53 = vpop.f32.mrb[15].mxu1 }
  0xf6   :  { %v318_v54 = vpop.f32.mrb[16].mxu1 }
  0xf7   :  { %v592_v55 = vpop.f32.mrb[17].mxu1 }
 0x1b8   :  { %v388_v57 = vpop.f32.mrb[0].mxu0 }
 0x1b9   :  { %v389_v58 = vadd.f32 %v388_v57, %v308_v50  ;;  %v627_v59 = vpop.f32.mrb[1].mxu0 }
 0x1bc   :  { %v393_v60 = vpop.f32.mrb[2].mxu0 }
 0x1bd   :  { %v394_v61 = vadd.f32 %v393_v60, %v313_v52  ;;  %v630_v62 = vpop.f32.mrb[3].mxu0 }
 0x1bf   :  { %v667_v63 = vpack.c.bf16 %v394_v61, %v389_v58 }
 0x1c0   :  { %v398_v0 = vpop.f32.mrb[4].mxu0 }
 0x1c1   :  { %v399_v1 = vadd.f32 %v398_v0, %v318_v54  ;;  %v633_v2 = vpop.f32.mrb[5].mxu0  ;;  %668 = vmatprep.subr.bf16.mxu1 %v667_v63 }
 0x1c2   :  { %670 = vmatpush3.bf16.msra.mxu1 %v667_v63 }
 0x1c3   :  { %638 = vmatprep.subr.mxu1 %v399_v1 }
 0x1c6   :  { %639 = vmatpush3.msra.mxu1 %v399_v1 }
 0x1c7   :  { %641 = vmatmul.mubr.msk.f32.vlgmr.msra.gmra.mrb[18].mxu1 %vm406_vm2, %v405_v3 }
 0x29a   :  { %v642_v5 = vpop.f32.mrb[18].mxu1 }
 0x29b   :  { %v505_v6 = vadd.f32 %v642_v5, %v523_v4  ;;  %v479_v7 = vpop.f32.mrb[19].mxu1 }
 0x29c   :  { %v504_v8 = vadd.f32 %v523_v4, %v479_v7 }
 0x29d   :  { %507 = vst [vmem:[%s861_s8 + $0x8] sm:$0xff] %v505_v6 }
 0x29e   :  { %506 = vst [vmem:[%s861_s8] sm:$0xff] %v504_v8 }

</bundles_post_ra>
